<compile_context>
chip_gen: v6e
topology: v6e:2x2x1
jax: 0.10.0
libtpu: 0.0.40
codegen_flags: <defaults>
</compile_context>

<pallas_src>
import functools

import jax
import jax.numpy as jnp
import numpy as np
from jax.experimental import pallas as pl
from jax.experimental.pallas import tpu as pltpu


def _round_up(x, m):
    return (x + m - 1) // m * m


# ----------------------------------------------------------------------------
# Fused kernel: batched input projection + sequential tree recurrence.
# ----------------------------------------------------------------------------
def treelstm_kernel(order_ref, nc_ref, child_ref,          # scalar prefetch (SMEM)
                    x_ref, wx_ref, bx_ref, wiouh_ref, wfh_ref,  # VMEM inputs
                    c_ref, h_ref,                           # VMEM outputs
                    xproj_ref, hgat_ref, cgat_ref,          # VMEM scratch
                    *, mem_dim, max_children, n_nodes):
    m = mem_dim

    # ---- Phase 1: fused, lane-dense input projection for ALL nodes at once.
    # xproj[:, 0:3m]  = ioux(x) + b_ioux + b_iouh
    # xproj[:, 3m:4m] = fx(x)   + b_fx   + b_fh
    # NOTE: operands kept f32 for exact parity with the reference; casting the
    # matmul operands to bf16 (preferred_element_type stays f32) is a further
    # v6e/v7x MXU-rate win if looser tolerance is acceptable.
    xproj_ref[...] = (
        jnp.dot(x_ref[...], wx_ref[...], preferred_element_type=jnp.float32)
        + bx_ref[...]
    )

    # ---- Phase 2: zero-init state tables and the child-gather scratch
    # (rows beyond max_children stay zero; masked slots never see garbage).
    c_ref[...] = jnp.zeros_like(c_ref)
    h_ref[...] = jnp.zeros_like(h_ref)
    hgat_ref[...] = jnp.zeros_like(hgat_ref)
    cgat_ref[...] = jnp.zeros_like(cgat_ref)

    # Hoisted loop invariants (weights live in vregs / VMEM across all nodes).
    w_iouh = wiouh_ref[...]
    w_fh = wfh_ref[...]
    row_ids = jax.lax.broadcasted_iota(jnp.int32, (hgat_ref.shape[0], 1), 0)

    # ---- Phase 3: sequential recurrence over the topological node order.
    @pl.loop(0, n_nodes)
    def _(t):
        n = order_ref[t]          # node id == row into all per-node tables
        nc = nc_ref[t]            # number of children of this node

        # One lane-dense (1, 4m) row load; slice the value (free).
        xrow = xproj_ref[pl.ds(n, 1), :]
        x_iou = xrow[:, 0:3 * m]          # (1, 3m)
        x_f = xrow[:, 3 * m:4 * m]        # (1, m)

        # Gather child states into a contiguous block (children were
        # processed earlier in topo order, so their rows are already valid).
        for k in range(max_children):
            idx = child_ref[t * max_children + k]
            hgat_ref[pl.ds(k, 1), :] = h_ref[pl.ds(idx, 1), :]
            cgat_ref[pl.ds(k, 1), :] = c_ref[pl.ds(idx, 1), :]

        mask = (row_ids < nc).astype(jnp.float32)        # (max_ch_pad, 1)
        ch_h = hgat_ref[...] * mask                      # invalid slots -> 0
        ch_c = cgat_ref[...]

        # ONE batched child matmul + ONE sigmoid block for all children.
        f = jax.nn.sigmoid(
            x_f + jnp.dot(ch_h, w_fh, preferred_element_type=jnp.float32))
        fc_sum = jnp.sum(mask * (f * ch_c), axis=0, keepdims=True)     # (1, m)
        child_h_sum = jnp.sum(ch_h, axis=0, keepdims=True)             # (1, m)

        iou = x_iou + jnp.dot(child_h_sum, w_iouh,
                              preferred_element_type=jnp.float32)
        i_g = jax.nn.sigmoid(iou[:, 0:m])
        o_g = jax.nn.sigmoid(iou[:, m:2 * m])
        u_g = jnp.tanh(iou[:, 2 * m:3 * m])

        c_new = i_g * u_g + fc_sum
        h_new = o_g * jnp.tanh(c_new)

        c_ref[pl.ds(n, 1), :] = c_new
        h_ref[pl.ds(n, 1), :] = h_new


def treelstm_forward(inputs, w_x, b_x, w_iouh, w_fh,
                     order, num_children, child_flat,
                     *, max_children, n_nodes):
    n_pad, in_dim = inputs.shape
    m = w_fh.shape[0]
    max_ch_pad = _round_up(max(max_children, 1), 8)

    kernel = functools.partial(
        treelstm_kernel, mem_dim=m, max_children=max_children, n_nodes=n_nodes)
    const = lambda i, *prefetch: (0, 0)   # whole array resident in VMEM

    c_all, h_all = pl.pallas_call(
        kernel,
        out_shape=(
            jax.ShapeDtypeStruct((n_pad, m), jnp.float32),
            jax.ShapeDtypeStruct((n_pad, m), jnp.float32),
        ),
        grid_spec=pltpu.PrefetchScalarGridSpec(
            num_scalar_prefetch=3,
            grid=(1,),                      # single step: loop lives in-kernel
            in_specs=[
                pl.BlockSpec((n_pad, in_dim), const),
                pl.BlockSpec((in_dim, 4 * m), const),
                pl.BlockSpec((1, 4 * m), const),
                pl.BlockSpec((m, 3 * m), const),
                pl.BlockSpec((m, m), const),
            ],
            out_specs=(
                pl.BlockSpec((n_pad, m), const),
                pl.BlockSpec((n_pad, m), const),
            ),
            scratch_shapes=[
                pltpu.VMEM((n_pad, 4 * m), jnp.float32),     # fused projection
                pltpu.VMEM((max_ch_pad, m), jnp.float32),    # child h gather
                pltpu.VMEM((max_ch_pad, m), jnp.float32),    # child c gather
            ],
        ),
        compiler_params=pltpu.CompilerParams(
            dimension_semantics=("arbitrary",),   # true sequential dependence
            vmem_limit_bytes=32 * 1024 * 1024,
        ),
    )(order, num_children, child_flat, inputs, w_x, b_x, w_iouh, w_fh)
    return c_all[:n_nodes], h_all[:n_nodes]


# ----------------------------------------------------------------------------
# Host-side wrapper: flatten the Python tree into a topological schedule.
# ----------------------------------------------------------------------------
def _topo_schedule(children, root, n_nodes):
    # TODO(synk): the dynamic Python-object tree recursion of the original
    # module has no Pallas equivalent; it is linearized host-side into a
    # (topo-order, child-count, flat child-index) schedule consumed via scalar
    # prefetch by the sequential recurrence loop.
    order = []

    def visit(node):
        for ch in children.get(node, ()):
            visit(ch)
        order.append(node)

    visit(root)
    assert len(order) == n_nodes, "tree must cover all input rows exactly once"

    max_ch = max(max((len(children.get(nd, ())) for nd in order), default=0), 1)
    nc = np.array([len(children.get(nd, ())) for nd in order], np.int32)
    child_flat = np.zeros((n_nodes * max_ch,), np.int32)   # 1D -> no SMEM blow-up
    for t, nd in enumerate(order):
        for k, ch in enumerate(children.get(nd, ())):
            child_flat[t * max_ch + k] = ch
    return np.array(order, np.int32), nc, child_flat, max_ch


def child_sum_tree_lstm(inputs, children, root,
                        w_ioux, b_ioux, w_iouh, b_iouh,
                        w_fx, b_fx, w_fh, b_fh):
    n_nodes, _ = inputs.shape
    m = w_fh.shape[0]

    order, nc, child_flat, max_ch = _topo_schedule(children, root, n_nodes)

    # Fuse the two input projections into one lane-dense (in_dim, 4m) matmul
    # and fold the bias pairs once on the host.
    w_x = jnp.concatenate([w_ioux, w_fx], axis=1).astype(jnp.float32)
    b_x = jnp.concatenate([b_ioux + b_iouh, b_fx + b_fh]).reshape(1, -1)
    b_x = b_x.astype(jnp.float32)

    n_pad = _round_up(n_nodes, 8)
    if n_pad != n_nodes:
        inputs = jnp.pad(inputs, ((0, n_pad - n_nodes), (0, 0)))

    c_all, h_all = treelstm_forward(
        inputs.astype(jnp.float32), w_x, b_x,
        w_iouh.astype(jnp.float32), w_fh.astype(jnp.float32),
        jnp.asarray(order), jnp.asarray(nc), jnp.asarray(child_flat),
        max_children=max_ch, n_nodes=n_nodes,
    )
    # Module returns the root state (and implicitly every node's state).
    return c_all[root:root + 1], h_all[root:root + 1], c_all, h_all


# ----------------------------------------------------------------------------
# Pure-JAX reference (mirrors the PyTorch recursion exactly).
# ----------------------------------------------------------------------------
def reference_treelstm(inputs, children, root,
                       w_ioux, b_ioux, w_iouh, b_iouh,
                       w_fx, b_fx, w_fh, b_fh):
    m = w_fh.shape[0]
    states = {}

    def rec(node):
        kids = children.get(node, ())
        for ch in kids:
            rec(ch)
        if kids:
            child_c = jnp.concatenate([states[ch][0] for ch in kids], axis=0)
            child_h = jnp.concatenate([states[ch][1] for ch in kids], axis=0)
        else:
            child_c = jnp.zeros((1, m), jnp.float32)
            child_h = jnp.zeros((1, m), jnp.float32)
        x = inputs[node:node + 1]
        child_h_sum = jnp.sum(child_h, axis=0, keepdims=True)
        iou = x @ w_ioux + b_ioux + child_h_sum @ w_iouh + b_iouh
        i = jax.nn.sigmoid(iou[:, :m])
        o = jax.nn.sigmoid(iou[:, m:2 * m])
        u = jnp.tanh(iou[:, 2 * m:])
        f = jax.nn.sigmoid(child_h @ w_fh + b_fh + (x @ w_fx + b_fx))
        fc = f * child_c
        c = i * u + jnp.sum(fc, axis=0, keepdims=True)
        h = o * jnp.tanh(c)
        states[node] = (c, h)
        return c, h

    c_root, h_root = rec(root)
    return c_root, h_root, states


if __name__ == "__main__":
    in_dim, mem_dim = 48, 32
    n_nodes = 8
    # Small deterministic dependency-style tree over the 8 input rows:
    #        3
    #      /   \
    #     1     5
    #    / \   /|\
    #   0   2 4 6 7
    children = {3: [1, 5], 1: [0, 2], 5: [4, 6, 7],
                0: [], 2: [], 4: [], 6: [], 7: []}
    root = 3

    key = jax.random.PRNGKey(0)
    keys = jax.random.split(key, 9)
    inputs = jax.random.normal(keys[0], (n_nodes, in_dim), dtype=jnp.float32)
    s = 0.1
    w_ioux = s * jax.random.normal(keys[1], (in_dim, 3 * mem_dim), jnp.float32)
    b_ioux = s * jax.random.normal(keys[2], (3 * mem_dim,), jnp.float32)
    w_iouh = s * jax.random.normal(keys[3], (mem_dim, 3 * mem_dim), jnp.float32)
    b_iouh = s * jax.random.normal(keys[4], (3 * mem_dim,), jnp.float32)
    w_fx = s * jax.random.normal(keys[5], (in_dim, mem_dim), jnp.float32)
    b_fx = s * jax.random.normal(keys[6], (mem_dim,), jnp.float32)
    w_fh = s * jax.random.normal(keys[7], (mem_dim, mem_dim), jnp.float32)
    b_fh = s * jax.random.normal(keys[8], (mem_dim,), jnp.float32)

    c_root, h_root, c_all, h_all = child_sum_tree_lstm(
        inputs, children, root,
        w_ioux, b_ioux, w_iouh, b_iouh, w_fx, b_fx, w_fh, b_fh)
    c_root = jax.block_until_ready(c_root)
    h_root = jax.block_until_ready(h_root)

    c_ref, h_ref, ref_states = reference_treelstm(
        inputs, children, root,
        w_ioux, b_ioux, w_iouh, b_iouh, w_fx, b_fx, w_fh, b_fh)

    assert c_root.shape == (1, mem_dim) and h_root.shape == (1, mem_dim)
    assert jnp.allclose(c_root, c_ref, atol=1e-4, rtol=1e-4)
    assert jnp.allclose(h_root, h_ref, atol=1e-4, rtol=1e-4)
    for node, (c_n, h_n) in ref_states.items():
        assert jnp.allclose(c_all[node:node + 1], c_n, atol=1e-4, rtol=1e-4)
        assert jnp.allclose(h_all[node:node + 1], h_n, atol=1e-4, rtol=1e-4)

    print("KERNEL_OK")
</pallas_src>

<mosaic_0001>
module attributes {stable_mosaic.version = 11 : i64} {
  func.func @treelstm_kernel(%arg0: i32, %arg1: memref<8xi32, #tpu.memory_space<smem>>, %arg2: memref<8xi32, #tpu.memory_space<smem>>, %arg3: memref<24xi32, #tpu.memory_space<smem>>, %arg4: memref<8x48xf32, #tpu.memory_space<vmem>>, %arg5: memref<48x128xf32, #tpu.memory_space<vmem>>, %arg6: memref<1x128xf32, #tpu.memory_space<vmem>>, %arg7: memref<32x96xf32, #tpu.memory_space<vmem>>, %arg8: memref<32x32xf32, #tpu.memory_space<vmem>>, %arg9: memref<8x32xf32, #tpu.memory_space<vmem>>, %arg10: memref<8x32xf32, #tpu.memory_space<vmem>>, %arg11: memref<8x128xf32, #tpu.memory_space<vmem>>, %arg12: memref<8x32xf32, #tpu.memory_space<vmem>>, %arg13: memref<8x32xf32, #tpu.memory_space<vmem>>) attributes {dimension_semantics = [#tpu.dimension_semantics<arbitrary>], iteration_bounds = array<i64: 1>, scalar_prefetch = 3 : i64, scratch_operands = 3 : i64, tpu.core_type = #tpu.core_type<tc>, window_params = [{pipeline_mode = #tpu.pipeline_mode<synchronous>, transform_indices = @transform_0, window_bounds = array<i64: 8, 48>}, {pipeline_mode = #tpu.pipeline_mode<synchronous>, transform_indices = @transform_1, window_bounds = array<i64: 48, 128>}, {pipeline_mode = #tpu.pipeline_mode<synchronous>, transform_indices = @transform_2, window_bounds = array<i64: 1, 128>}, {pipeline_mode = #tpu.pipeline_mode<synchronous>, transform_indices = @transform_3, window_bounds = array<i64: 32, 96>}, {pipeline_mode = #tpu.pipeline_mode<synchronous>, transform_indices = @transform_4, window_bounds = array<i64: 32, 32>}, {pipeline_mode = #tpu.pipeline_mode<synchronous>, transform_indices = @transform_5, window_bounds = array<i64: 8, 32>}, {pipeline_mode = #tpu.pipeline_mode<synchronous>, transform_indices = @transform_6, window_bounds = array<i64: 8, 32>}]} {
    %c0 = arith.constant 0 : index
    %c0_0 = arith.constant 0 : index
    %0 = vector.load %arg4[%c0, %c0_0] : memref<8x48xf32, #tpu.memory_space<vmem>>, vector<8x48xf32>
    %c0_1 = arith.constant 0 : index
    %c0_2 = arith.constant 0 : index
    %1 = vector.load %arg5[%c0_1, %c0_2] : memref<48x128xf32, #tpu.memory_space<vmem>>, vector<48x128xf32>
    %cst = arith.constant dense<0.000000e+00> : vector<8x128xf32>
    %2 = tpu.matmul %0, %1, %cst {dimension_numbers = #tpu.dot_dimension_numbers<[1], [0], [0], [1], [0, 0, 1, 1], [], []>} : vector<8x48xf32>, vector<48x128xf32>, vector<8x128xf32> -> vector<8x128xf32>
    %c0_3 = arith.constant 0 : index
    %c0_4 = arith.constant 0 : index
    %3 = vector.load %arg6[%c0_3, %c0_4] : memref<1x128xf32, #tpu.memory_space<vmem>>, vector<1x128xf32>
    %4 = vector.broadcast %3 : vector<1x128xf32> to vector<8x128xf32>
    %5 = arith.addf %2, %4 : vector<8x128xf32>
    %c0_5 = arith.constant 0 : index
    %c0_6 = arith.constant 0 : index
    %6 = vector.load %arg11[%c0_5, %c0_6] : memref<8x128xf32, #tpu.memory_space<vmem>>, vector<8x128xf32>
    tpu.vector_store %arg11[%c0_5, %c0_6], %5 {strides = array<i32>} : memref<8x128xf32, #tpu.memory_space<vmem>>, vector<8x128xf32>,
    %cst_7 = arith.constant 0.000000e+00 : f32
    %7 = vector.broadcast %cst_7 : f32 to vector<8x32xf32>
    %c0_8 = arith.constant 0 : index
    %c0_9 = arith.constant 0 : index
    %8 = vector.load %arg9[%c0_8, %c0_9] : memref<8x32xf32, #tpu.memory_space<vmem>>, vector<8x32xf32>
    tpu.vector_store %arg9[%c0_8, %c0_9], %7 {strides = array<i32>} : memref<8x32xf32, #tpu.memory_space<vmem>>, vector<8x32xf32>,
    %cst_10 = arith.constant 0.000000e+00 : f32
    %9 = vector.broadcast %cst_10 : f32 to vector<8x32xf32>
    %c0_11 = arith.constant 0 : index
    %c0_12 = arith.constant 0 : index
    %10 = vector.load %arg10[%c0_11, %c0_12] : memref<8x32xf32, #tpu.memory_space<vmem>>, vector<8x32xf32>
    tpu.vector_store %arg10[%c0_11, %c0_12], %9 {strides = array<i32>} : memref<8x32xf32, #tpu.memory_space<vmem>>, vector<8x32xf32>,
    %cst_13 = arith.constant 0.000000e+00 : f32
    %11 = vector.broadcast %cst_13 : f32 to vector<8x32xf32>
    %c0_14 = arith.constant 0 : index
    %c0_15 = arith.constant 0 : index
    %12 = vector.load %arg12[%c0_14, %c0_15] : memref<8x32xf32, #tpu.memory_space<vmem>>, vector<8x32xf32>
    tpu.vector_store %arg12[%c0_14, %c0_15], %11 {strides = array<i32>} : memref<8x32xf32, #tpu.memory_space<vmem>>, vector<8x32xf32>,
    %cst_16 = arith.constant 0.000000e+00 : f32
    %13 = vector.broadcast %cst_16 : f32 to vector<8x32xf32>
    %c0_17 = arith.constant 0 : index
    %c0_18 = arith.constant 0 : index
    %14 = vector.load %arg13[%c0_17, %c0_18] : memref<8x32xf32, #tpu.memory_space<vmem>>, vector<8x32xf32>
    tpu.vector_store %arg13[%c0_17, %c0_18], %13 {strides = array<i32>} : memref<8x32xf32, #tpu.memory_space<vmem>>, vector<8x32xf32>,
    %c0_19 = arith.constant 0 : index
    %c0_20 = arith.constant 0 : index
    %15 = vector.load %arg7[%c0_19, %c0_20] : memref<32x96xf32, #tpu.memory_space<vmem>>, vector<32x96xf32>
    %c0_21 = arith.constant 0 : index
    %c0_22 = arith.constant 0 : index
    %16 = vector.load %arg8[%c0_21, %c0_22] : memref<32x32xf32, #tpu.memory_space<vmem>>, vector<32x32xf32>
    %17 = tpu.iota {dimensions = array<i32: 0>} : vector<8x1xi32>
    %c0_i32 = arith.constant 0 : i32
    %c8_i32 = arith.constant 8 : i32
    %18 = arith.addi %c0_i32, %c8_i32 : i32
    %c1_i32 = arith.constant 1 : i32
    scf.for %arg14 = %c0_i32 to %18 step %c1_i32  : i32 {
      %c1_i32_24 = arith.constant 1 : i32
      %19 = arith.muli %arg14, %c1_i32_24 : i32
      %c0_i32_25 = arith.constant 0 : i32
      %20 = arith.addi %c0_i32_25, %19 : i32
      %21 = arith.index_cast %20 : i32 to index
      %22 = memref.load %arg1[%21] : memref<8xi32, #tpu.memory_space<smem>>
      %23 = arith.index_cast %20 : i32 to index
      %24 = memref.load %arg2[%23] : memref<8xi32, #tpu.memory_space<smem>>
      %25 = arith.index_cast %22 : i32 to index
      %c0_26 = arith.constant 0 : index
      %26 = vector.load %arg11[%25, %c0_26] : memref<8x128xf32, #tpu.memory_space<vmem>>, vector<1x128xf32>
      %27 = vector.extract_strided_slice %26 {offsets = [0, 0], sizes = [1, 96], strides = [1, 1]} : vector<1x128xf32> to vector<1x96xf32>
      %28 = vector.extract_strided_slice %26 {offsets = [0, 96], sizes = [1, 32], strides = [1, 1]} : vector<1x128xf32> to vector<1x32xf32>
      %c3_i32 = arith.constant 3 : i32
      %29 = arith.muli %20, %c3_i32 : i32
      %c0_i32_27 = arith.constant 0 : i32
      %30 = arith.addi %29, %c0_i32_27 : i32
      %31 = arith.index_cast %30 : i32 to index
      %32 = memref.load %arg3[%31] : memref<24xi32, #tpu.memory_space<smem>>
      %33 = arith.index_cast %32 : i32 to index
      %c0_28 = arith.constant 0 : index
      %34 = vector.load %arg10[%33, %c0_28] : memref<8x32xf32, #tpu.memory_space<vmem>>, vector<1x32xf32>
      %c0_29 = arith.constant 0 : index
      %c0_30 = arith.constant 0 : index
      %35 = vector.load %arg12[%c0_29, %c0_30] : memref<8x32xf32, #tpu.memory_space<vmem>>, vector<1x32xf32>
      tpu.vector_store %arg12[%c0_29, %c0_30], %34 {strides = array<i32>} : memref<8x32xf32, #tpu.memory_space<vmem>>, vector<1x32xf32>,
      %36 = arith.index_cast %32 : i32 to index
      %c0_31 = arith.constant 0 : index
      %37 = vector.load %arg9[%36, %c0_31] : memref<8x32xf32, #tpu.memory_space<vmem>>, vector<1x32xf32>
      %c0_32 = arith.constant 0 : index
      %c0_33 = arith.constant 0 : index
      %38 = vector.load %arg13[%c0_32, %c0_33] : memref<8x32xf32, #tpu.memory_space<vmem>>, vector<1x32xf32>
      tpu.vector_store %arg13[%c0_32, %c0_33], %37 {strides = array<i32>} : memref<8x32xf32, #tpu.memory_space<vmem>>, vector<1x32xf32>,
      %c3_i32_34 = arith.constant 3 : i32
      %39 = arith.muli %20, %c3_i32_34 : i32
      %c1_i32_35 = arith.constant 1 : i32
      %40 = arith.addi %39, %c1_i32_35 : i32
      %41 = arith.index_cast %40 : i32 to index
      %42 = memref.load %arg3[%41] : memref<24xi32, #tpu.memory_space<smem>>
      %43 = arith.index_cast %42 : i32 to index
      %c0_36 = arith.constant 0 : index
      %44 = vector.load %arg10[%43, %c0_36] : memref<8x32xf32, #tpu.memory_space<vmem>>, vector<1x32xf32>
      %c1 = arith.constant 1 : index
      %c0_37 = arith.constant 0 : index
      %45 = vector.load %arg12[%c1, %c0_37] : memref<8x32xf32, #tpu.memory_space<vmem>>, vector<1x32xf32>
      tpu.vector_store %arg12[%c1, %c0_37], %44 {strides = array<i32>} : memref<8x32xf32, #tpu.memory_space<vmem>>, vector<1x32xf32>,
      %46 = arith.index_cast %42 : i32 to index
      %c0_38 = arith.constant 0 : index
      %47 = vector.load %arg9[%46, %c0_38] : memref<8x32xf32, #tpu.memory_space<vmem>>, vector<1x32xf32>
      %c1_39 = arith.constant 1 : index
      %c0_40 = arith.constant 0 : index
      %48 = vector.load %arg13[%c1_39, %c0_40] : memref<8x32xf32, #tpu.memory_space<vmem>>, vector<1x32xf32>
      tpu.vector_store %arg13[%c1_39, %c0_40], %47 {strides = array<i32>} : memref<8x32xf32, #tpu.memory_space<vmem>>, vector<1x32xf32>,
      %c3_i32_41 = arith.constant 3 : i32
      %49 = arith.muli %20, %c3_i32_41 : i32
      %c2_i32 = arith.constant 2 : i32
      %50 = arith.addi %49, %c2_i32 : i32
      %51 = arith.index_cast %50 : i32 to index
      %52 = memref.load %arg3[%51] : memref<24xi32, #tpu.memory_space<smem>>
      %53 = arith.index_cast %52 : i32 to index
      %c0_42 = arith.constant 0 : index
      %54 = vector.load %arg10[%53, %c0_42] : memref<8x32xf32, #tpu.memory_space<vmem>>, vector<1x32xf32>
      %c2 = arith.constant 2 : index
      %c0_43 = arith.constant 0 : index
      %55 = vector.load %arg12[%c2, %c0_43] : memref<8x32xf32, #tpu.memory_space<vmem>>, vector<1x32xf32>
      tpu.vector_store %arg12[%c2, %c0_43], %54 {strides = array<i32>} : memref<8x32xf32, #tpu.memory_space<vmem>>, vector<1x32xf32>,
      %56 = arith.index_cast %52 : i32 to index
      %c0_44 = arith.constant 0 : index
      %57 = vector.load %arg9[%56, %c0_44] : memref<8x32xf32, #tpu.memory_space<vmem>>, vector<1x32xf32>
      %c2_45 = arith.constant 2 : index
      %c0_46 = arith.constant 0 : index
      %58 = vector.load %arg13[%c2_45, %c0_46] : memref<8x32xf32, #tpu.memory_space<vmem>>, vector<1x32xf32>
      tpu.vector_store %arg13[%c2_45, %c0_46], %57 {strides = array<i32>} : memref<8x32xf32, #tpu.memory_space<vmem>>, vector<1x32xf32>,
      %59 = vector.broadcast %24 : i32 to vector<8x1xi32>
      %60 = arith.cmpi slt, %17, %59 : vector<8x1xi32>
      %61 = arith.extui %60 : vector<8x1xi1> to vector<8x1xi32>
      %62 = arith.sitofp %61 : vector<8x1xi32> to vector<8x1xf32>
      %c0_47 = arith.constant 0 : index
      %c0_48 = arith.constant 0 : index
      %63 = vector.load %arg12[%c0_47, %c0_48] : memref<8x32xf32, #tpu.memory_space<vmem>>, vector<8x32xf32>
      %64 = vector.broadcast %62 : vector<8x1xf32> to vector<8x32xf32>
      %65 = arith.mulf %63, %64 : vector<8x32xf32>
      %c0_49 = arith.constant 0 : index
      %c0_50 = arith.constant 0 : index
      %66 = vector.load %arg13[%c0_49, %c0_50] : memref<8x32xf32, #tpu.memory_space<vmem>>, vector<8x32xf32>
      %cst_51 = arith.constant dense<0.000000e+00> : vector<8x32xf32>
      %67 = tpu.matmul %65, %16, %cst_51 {dimension_numbers = #tpu.dot_dimension_numbers<[1], [0], [0], [1], [0, 0, 1, 1], [], []>} : vector<8x32xf32>, vector<32x32xf32>, vector<8x32xf32> -> vector<8x32xf32>
      %68 = vector.broadcast %28 : vector<1x32xf32> to vector<8x32xf32>
      %69 = arith.addf %68, %67 : vector<8x32xf32>
      %70 = arith.negf %69 : vector<8x32xf32>
      %71 = math.exp %70 : vector<8x32xf32>
      %cst_52 = arith.constant 1.000000e+00 : f32
      %72 = vector.broadcast %cst_52 : f32 to vector<8x32xf32>
      %73 = arith.addf %72, %71 : vector<8x32xf32>
      %74 = arith.divf %72, %73 : vector<8x32xf32>
      %75 = arith.mulf %74, %66 : vector<8x32xf32>
      %76 = vector.broadcast %62 : vector<8x1xf32> to vector<8x32xf32>
      %77 = arith.mulf %76, %75 : vector<8x32xf32>
      %cst_53 = arith.constant dense<0.000000e+00> : vector<32xf32>
      %78 = vector.multi_reduction <add>, %77, %cst_53 [0] : vector<8x32xf32> to vector<32xf32>
      %79 = vector.shape_cast %78 : vector<32xf32> to vector<1x32xf32>
      %cst_54 = arith.constant dense<0.000000e+00> : vector<32xf32>
      %80 = vector.multi_reduction <add>, %65, %cst_54 [0] : vector<8x32xf32> to vector<32xf32>
      %81 = vector.shape_cast %80 : vector<32xf32> to vector<1x32xf32>
      %cst_55 = arith.constant dense<0.000000e+00> : vector<1x96xf32>
      %82 = tpu.matmul %81, %15, %cst_55 {dimension_numbers = #tpu.dot_dimension_numbers<[1], [0], [0], [1], [0, 0, 1, 1], [], []>} : vector<1x32xf32>, vector<32x96xf32>, vector<1x96xf32> -> vector<1x96xf32>
      %83 = arith.addf %27, %82 : vector<1x96xf32>
      %84 = vector.extract_strided_slice %83 {offsets = [0, 0], sizes = [1, 32], strides = [1, 1]} : vector<1x96xf32> to vector<1x32xf32>
      %85 = arith.negf %84 : vector<1x32xf32>
      %86 = math.exp %85 : vector<1x32xf32>
      %cst_56 = arith.constant 1.000000e+00 : f32
      %87 = vector.broadcast %cst_56 : f32 to vector<1x32xf32>
      %88 = arith.addf %87, %86 : vector<1x32xf32>
      %89 = arith.divf %87, %88 : vector<1x32xf32>
      %90 = vector.extract_strided_slice %83 {offsets = [0, 32], sizes = [1, 32], strides = [1, 1]} : vector<1x96xf32> to vector<1x32xf32>
      %91 = arith.negf %90 : vector<1x32xf32>
      %92 = math.exp %91 : vector<1x32xf32>
      %cst_57 = arith.constant 1.000000e+00 : f32
      %93 = vector.broadcast %cst_57 : f32 to vector<1x32xf32>
      %94 = arith.addf %93, %92 : vector<1x32xf32>
      %95 = arith.divf %93, %94 : vector<1x32xf32>
      %96 = vector.extract_strided_slice %83 {offsets = [0, 64], sizes = [1, 32], strides = [1, 1]} : vector<1x96xf32> to vector<1x32xf32>
      %97 = math.tanh %96 : vector<1x32xf32>
      %98 = arith.mulf %89, %97 : vector<1x32xf32>
      %99 = arith.addf %98, %79 : vector<1x32xf32>
      %100 = math.tanh %99 : vector<1x32xf32>
      %101 = arith.mulf %95, %100 : vector<1x32xf32>
      %102 = arith.index_cast %22 : i32 to index
      %c0_58 = arith.constant 0 : index
      %103 = vector.load %arg9[%102, %c0_58] : memref<8x32xf32, #tpu.memory_space<vmem>>, vector<1x32xf32>
      tpu.vector_store %arg9[%102, %c0_58], %99 {strides = array<i32>} : memref<8x32xf32, #tpu.memory_space<vmem>>, vector<1x32xf32>,
      %104 = arith.index_cast %22 : i32 to index
      %c0_59 = arith.constant 0 : index
      %105 = vector.load %arg10[%104, %c0_59] : memref<8x32xf32, #tpu.memory_space<vmem>>, vector<1x32xf32>
      tpu.vector_store %arg10[%104, %c0_59], %101 {strides = array<i32>} : memref<8x32xf32, #tpu.memory_space<vmem>>, vector<1x32xf32>,
    }
    %c8_i32_23 = arith.constant 8 : i32
    return
  }
  func.func @transform_0(%arg0: i32, %arg1: memref<8xi32, #tpu.memory_space<smem>>, %arg2: memref<8xi32, #tpu.memory_space<smem>>, %arg3: memref<24xi32, #tpu.memory_space<smem>>) -> (i32, i32) {
    %c0_i32 = arith.constant 0 : i32
    %c0_i32_0 = arith.constant 0 : i32
    %c0_i32_1 = arith.constant 0 : i32
    return %c0_i32, %c0_i32_0 : i32, i32
  }
  func.func @transform_1(%arg0: i32, %arg1: memref<8xi32, #tpu.memory_space<smem>>, %arg2: memref<8xi32, #tpu.memory_space<smem>>, %arg3: memref<24xi32, #tpu.memory_space<smem>>) -> (i32, i32) {
    %c0_i32 = arith.constant 0 : i32
    %c0_i32_0 = arith.constant 0 : i32
    %c0_i32_1 = arith.constant 0 : i32
    return %c0_i32, %c0_i32_0 : i32, i32
  }
  func.func @transform_2(%arg0: i32, %arg1: memref<8xi32, #tpu.memory_space<smem>>, %arg2: memref<8xi32, #tpu.memory_space<smem>>, %arg3: memref<24xi32, #tpu.memory_space<smem>>) -> (i32, i32) {
    %c0_i32 = arith.constant 0 : i32
    %c0_i32_0 = arith.constant 0 : i32
    %c0_i32_1 = arith.constant 0 : i32
    return %c0_i32, %c0_i32_0 : i32, i32
  }
  func.func @transform_3(%arg0: i32, %arg1: memref<8xi32, #tpu.memory_space<smem>>, %arg2: memref<8xi32, #tpu.memory_space<smem>>, %arg3: memref<24xi32, #tpu.memory_space<smem>>) -> (i32, i32) {
    %c0_i32 = arith.constant 0 : i32
    %c0_i32_0 = arith.constant 0 : i32
    %c0_i32_1 = arith.constant 0 : i32
    return %c0_i32, %c0_i32_0 : i32, i32
  }
  func.func @transform_4(%arg0: i32, %arg1: memref<8xi32, #tpu.memory_space<smem>>, %arg2: memref<8xi32, #tpu.memory_space<smem>>, %arg3: memref<24xi32, #tpu.memory_space<smem>>) -> (i32, i32) {
    %c0_i32 = arith.constant 0 : i32
    %c0_i32_0 = arith.constant 0 : i32
    %c0_i32_1 = arith.constant 0 : i32
    return %c0_i32, %c0_i32_0 : i32, i32
  }
  func.func @transform_5(%arg0: i32, %arg1: memref<8xi32, #tpu.memory_space<smem>>, %arg2: memref<8xi32, #tpu.memory_space<smem>>, %arg3: memref<24xi32, #tpu.memory_space<smem>>) -> (i32, i32) {
    %c0_i32 = arith.constant 0 : i32
    %c0_i32_0 = arith.constant 0 : i32
    %c0_i32_1 = arith.constant 0 : i32
    return %c0_i32, %c0_i32_0 : i32, i32
  }
  func.func @transform_6(%arg0: i32, %arg1: memref<8xi32, #tpu.memory_space<smem>>, %arg2: memref<8xi32, #tpu.memory_space<smem>>, %arg3: memref<24xi32, #tpu.memory_space<smem>>) -> (i32, i32) {
    %c0_i32 = arith.constant 0 : i32
    %c0_i32_0 = arith.constant 0 : i32
    %c0_i32_1 = arith.constant 0 : i32
    return %c0_i32, %c0_i32_0 : i32, i32
  }
}

</mosaic_0001>

<bundles_post_ra>
// kernel: tpu_custom_call.1
= control target key start
LH: loop header
LB: loop body
LE: loop exit
PB: predicated region body
PF: predicated region fallthrough
CT: control target
= control target key end

     0   :  { %s768_s30 = smov [#allocation6]   ;;  %s942_s0 = inlined_call_operand.hbm [shape: s32[8], index: 0, kind: input, shape index: {}]   ;;  %s943_s3 = inlined_call_operand.hbm [shape: f32[8,48], index: 3, kind: input, shape index: {}]   ;;  %s944_s4 = inlined_call_operand.hbm [shape: f32[48,128], index: 4, kind: input, shape index: {}]   ;;  %s945_s5 = inlined_call_operand.vmem [shape: f32[1,128], index: 5, kind: input, shape index: {}]   ;;  %s946_s6 = inlined_call_operand.hbm [shape: f32[32,96], index: 6, kind: input, shape index: {}]   ;;  %s947_s7 = inlined_call_operand.hbm [shape: f32[32,32], index: 7, kind: input, shape index: {}]   ;;  %s948_s8 = inlined_call_operand.hbm [shape: f32[8,32], index: 8, kind: output, shape index: {0}]   ;;  %s949_s9 = inlined_call_operand.hbm [shape: f32[8,32], index: 9, kind: output, shape index: {1}]   ;;  %s950_s1 = inlined_call_operand.vmem [shape: s32[8], index: 1, kind: input, shape index: {}]   ;;  %s951_s2 = inlined_call_operand.vmem [shape: s32[24], index: 2, kind: input, shape index: {}]  }
   0x1   :  { %16 = dma.hbm_to_smem %s942_s0, 16, %s768_s30, [#allocation5] }
   0x2   :  { %s17_s14 = sshll.u32 %s950_s1, 4  ;;  %s21_s17 = sshll.u32 %s951_s2, 4  ;;  %s18_s14 = int_to_ptr.vmem [resolvable:$true] %s17_s14  ;;  %s22_s17 = int_to_ptr.vmem [resolvable:$true] %s21_s17 }
   0x3   :  { %s604_s18 = scalar_lea.vmem %s18_s14, 16  ;;  %p609_p1 = scmp.lt.s32.totalorder %s18_s14, %s18_s14 }
   0x4   :  { %p605_p0 = scmp.ne.s32.totalorder %s18_s14, %s604_s18  ;;  %p610_p2 = scmp.lt.s32.totalorder %s604_s18, %s604_s18 }
   0x6   :  { %p611_p3 = por %p610_p2, %p609_p1 }
   0x8   :  { %p612_p4 = pnand %p611_p3, %p605_p0 }
   0xa   :  { %615 = shalt.err (!%p612_p4)  }
   0xb   :  { %s769_s19 = smov [#allocation7]   ;;  %s616_s0 = scalar_lea.vmem %s22_s17, 16 }
   0xc   :  { %20 = dma.vmem_to_smem %s18_s14, 16, %s769_s19, [#allocation5] }
   0xd   :  { %p617_p5 = scmp.ne.s32.totalorder %s22_s17, %s616_s0  ;;  %p621_p6 = scmp.lt.s32.totalorder %s22_s17, %s22_s17 }
   0xe   :  { %p622_p7 = scmp.lt.s32.totalorder %s616_s0, %s616_s0 }
  0x10   :  { %p623_p8 = por %p622_p7, %p621_p6 }
  0x12   :  { %p624_p9 = pnand %p623_p8, %p617_p5 }
  0x14   :  { %627 = shalt.err (!%p624_p9)  }
  0x15   :  { %s770_s1 = smov [#allocation8]  }
  0x16   :  { %24 = dma.vmem_to_smem %s22_s17, 16, %s770_s1, [#allocation5] }
  0x17   :  { %752 = dma.done.wait [#allocation5], 48 }
  0x18   :  { %753 = vsyncadd [#allocation5], 4294967248 }
  0x19   :  { %26 = sfence }
  0x1a   :  { %27 = vsyncpa [#allocation10], 0 }
  0x1b   :  { %28 = vsyncpa [#allocation13], 0 }
  0x1c   :  { %29 = vsyncpa [#allocation16], 0 }
  0x1d   :  { %30 = vsyncpa [#allocation11], 0 }
  0x1e   :  { %31 = vsyncpa [#allocation19], 0  ;;  %s771_s2 = smov [#allocation12]  }
  0x1f   :  { %s47_s20 = sshll.u32 %s771_s2, 4  ;;  %s48_s20 = int_to_ptr.vmem [resolvable:$true] %s47_s20 }
  0x20   :  { %s636_s21 = scalar_lea.vmem %s48_s20, 768  ;;  %p641_p11 = scmp.lt.s32.totalorder %s48_s20, %s48_s20 }
  0x21   :  { %p637_p10 = scmp.ne.s32.totalorder %s48_s20, %s636_s21  ;;  %p642_p12 = scmp.lt.s32.totalorder %s636_s21, %s636_s21 }
  0x23   :  { %p643_p13 = por %p642_p12, %p641_p11 }
  0x25   :  { %p644_p0 = pnand %p643_p13, %p637_p10 }
  0x27   :  { %647 = shalt.err (!%p644_p0)
}
  0x28   :  { %s772_s22 = smov 128   ;;  %s773_s23 = smov 8  }
  0x29   :  { %53 = dma.hbm_to_vmem [thread:$0]  %s944_s4, 768, %s48_s20, [#allocation13], %s772_s22, %s772_s22, %s773_s23  }
  0x2a   :  { %s774_s26 = smov [#allocation9]   ;;  %s775_s28 = smov [#allocation14]  }
  0x2b   :  { %s38_s27 = sshll.u32 %s774_s26, 4  ;;  %s61_s29 = sshll.u32 %s775_s28, 4  ;;  %s39_s27 = int_to_ptr.vmem [resolvable:$true] %s38_s27  ;;  %s62_s29 = int_to_ptr.vmem [resolvable:$true] %s61_s29 }
  0x2c   :  { %s656_s30 = scalar_lea.vmem %s39_s27, 128  ;;  %p661_p2 = scmp.lt.s32.totalorder %s39_s27, %s39_s27 }
  0x2d   :  { %p657_p1 = scmp.ne.s32.totalorder %s39_s27, %s656_s30  ;;  %p662_p3 = scmp.lt.s32.totalorder %s656_s30, %s656_s30 }
  0x2f   :  { %p663_p4 = por %p662_p3, %p661_p2 }
  0x31   :  { %p664_p5 = pnand %p663_p4, %p657_p1 }
  0x33   :  { %667 = shalt.err (!%p664_p5)
}
  0x34   :  { %41 = dma.hbm_to_vmem [thread:$0]  %s943_s3, 128, %s39_s27, [#allocation10]  }
  0x35   :  { %s676_s12 = scalar_lea.vmem %s62_s29, 512  ;;  %p681_p7 = scmp.lt.s32.totalorder %s62_s29, %s62_s29 }
  0x36   :  { %p677_p6 = scmp.ne.s32.totalorder %s62_s29, %s676_s12  ;;  %p682_p8 = scmp.lt.s32.totalorder %s676_s12, %s676_s12 }
  0x38   :  { %p683_p9 = por %p682_p8, %p681_p7 }
  0x3a   :  { %p684_p10 = pnand %p683_p9, %p677_p6 }
  0x3c   :  { %687 = shalt.err (!%p684_p10)
}
  0x3d   :  { %67 = dma.hbm_to_vmem [thread:$0]  %s946_s6, 512, %s62_s29, [#allocation13], %s772_s22, %s772_s22, %s773_s23  }
  0x3e   :  { %s776_s14 = smov [#allocation15]  }
  0x3f   :  { %s73_s15 = sshll.u32 %s776_s14, 4  ;;  %s74_s15 = int_to_ptr.vmem [resolvable:$true] %s73_s15 }
  0x40   :  { %s696_s16 = scalar_lea.vmem %s74_s15, 512  ;;  %p701_p12 = scmp.lt.s32.totalorder %s74_s15, %s74_s15 }
  0x41   :  { %p697_p11 = scmp.ne.s32.totalorder %s74_s15, %s696_s16  ;;  %p702_p13 = scmp.lt.s32.totalorder %s696_s16, %s696_s16 }
  0x43   :  { %p703_p0 = por %p702_p13, %p701_p12 }
  0x45   :  { %p704_p1 = pnand %p703_p0, %p697_p11 }
  0x47   :  { %707 = shalt.err (!%p704_p1)
}
  0x48   :  { %79 = dma.hbm_to_vmem [thread:$0]  %s947_s7, 512, %s74_s15, [#allocation16], %s772_s22, %s772_s22, %s773_s23  }
  0x49   :  { %754 = dma.done.wait [#allocation10], 128  }
  0x4a   :  { %755 = vsyncadd [#allocation10], 4294967168 }
  0x4b   :  { %756 = dma.done.wait [#allocation13], 1280  }
  0x4c   :  { %757 = vsyncadd [#allocation13], 4294966016 }
  0x4d   :  { %758 = dma.done.wait [#allocation16], 512  }
  0x4e   :  { %759 = vsyncadd [#allocation16], 4294966784  ;;  %vm181_vm0 = vcmask 261120   ;;  %v777_v0 = vmov 0.0   ;;  %vm778_vm1 = vmmov 0   ;;  %v870_v1 = vld [vmem:[#allocation14] sm:$0xff]  ;;  %v194_v16 = vlaneseq }
  0x4f   :  { %521 = vmatprep.subr.mxu0 %v777_v0  ;;  %182 = vst.msk [vmem:[#allocation17] sm:$0xff] %vm181_vm0, %v777_v0  ;;  %183 = vst.msk [vmem:[#allocation18] sm:$0xff] %vm181_vm0, %v777_v0  ;;  %533 = vmatprep.mubr.msk.f32.mxu0 %vm778_vm1, %v777_v0  ;;  %v872_v2 = vld [vmem:[#allocation14 + $0x8] sm:$0xff]  ;;  %v874_v3 = vld [vmem:[#allocation14 + $0x10] sm:$0xff]  ;;  %vm106_vm2 = vcmask 392192   ;;  %s891_s18 = smov 0  }
  0x50   :  { %184 = vst.msk [vmem:[#allocation3] sm:$0xff] %vm181_vm0, %v777_v0  ;;  %185 = vst.msk [vmem:[#allocation4] sm:$0xff] %vm181_vm0, %v777_v0  ;;  %v876_v4 = vld [vmem:[#allocation14 + $0x18] sm:$0xff]  ;;  %v878_v5 = vld [vmem:[#allocation15] sm:$0xff]  ;;  %v886_v17 = vshrl.u32 %v194_v16, 7 }
  0x51   :  { %v880_v6 = vld [vmem:[#allocation15 + $0x8] sm:$0xff]  ;;  %v882_v7 = vld [vmem:[#allocation15 + $0x10] sm:$0xff]  ;;  %v884_v8 = vld [vmem:[#allocation15 + $0x18] sm:$0xff] }
  0x52   :  { %v98_v9 = vld [vmem:[#allocation12 + $0x28] sm:$0xff]  ;;  %v97_v10 = vld [vmem:[#allocation12 + $0x20] sm:$0xff]  ;;  %v96_v11 = vld [vmem:[#allocation12 + $0x18] sm:$0xff] }
  0x53   :  { %522 = vmatpush3.msra.mxu0 %v98_v9  ;;  %v95_v12 = vld [vmem:[#allocation12 + $0x10] sm:$0xff]  ;;  %v94_v13 = vld [vmem:[#allocation12 + $0x8] sm:$0xff]  ;;  %v93_v14 = vld [vmem:[#allocation12] sm:$0xff] }
  0x54   :  { %523 = vmatprep.subr.mxu0 %v777_v0  ;;  %v92_v15 = vld [vmem:[#allocation9] sm:$0xff]  ;;  %v497_v18 = vld [vmem:[%s945_s5] ss:$0 sm:$0xff] }
  0x55   :  { %524 = vmatpush3.msra.mxu0 %v97_v10 }
  0x56   :  { %525 = vmatprep.subr.mxu0 %v777_v0 }
  0x57   :  { %526 = vmatpush3.msra.mxu0 %v96_v11 }
  0x58   :  { %527 = vmatprep.subr.mxu0 %v777_v0 }
  0x59   :  { %528 = vmatpush3.msra.mxu0 %v95_v12 }
  0x5a   :  { %529 = vmatprep.subr.mxu0 %v777_v0 }
  0x5b   :  { %530 = vmatpush3.msra.mxu0 %v94_v13 }
  0x5c   :  { %531 = vmatprep.subr.mxu0 %v777_v0 }
  0x5d   :  { %532 = vmatpush3.msra.mxu0 %v93_v14 }
  0x5e   :  { %534 = vmatmul.mubr.msk.f32.vlgmr.msra.gmra.mxu0 %vm106_vm2, %v92_v15 }
 0x11e   :  { %v176_v19 = vpop.f32.mrf.mxu0 }
 0x11f   :  { %v177_v20 = vadd.f32 %v497_v18, %v176_v19 }
 0x120   :  { %v535_v21 = vpop.f32.mrf.mxu0 }
 0x121   :  { %180 = vst [vmem:[#allocation2] sm:$0xff] %v177_v20 }
 0x122 LB: > { %v779_v22 = vmov 0.0   ;;  %vm780_vm3 = vmmov 0   ;;  %s206_s5 = smul.u32 3, %s766_s18  ;;  %s900_s19 = sld [smem:[#allocation7 + %s766_s18]]  ;;  %vm210_vm4 = vcmask 253952   ;;  %v313_v48 = vsub.s32 0, %v886_v17  ;;  %s766_s18 = sphi %s891_s18, %s201_s18  }
 0x123   : > { %536 = vmatprep.subr.mxu0 %v779_v22  ;;  %544 = vmatprep.mubr.msk.f32.mxu0 %vm780_vm3, %v779_v22  ;;  %s922_s28 = sld [smem:[#allocation6 + %s766_s18]]  ;;  %s781_s29 = smov 96   ;;  %vm332_vm6 = vcmask 1048320  }
 0x124   : > { %537 = vmatpush3.msra.mxu0 %v884_v8  ;;  %547 = vmatprep.subr.mxu1 %v779_v22  ;;  %s207_s0 = sld [smem:[#allocation8 + %s206_s5]]  ;;  %s215_s1 = sadd.s32 1, %s206_s5 }
 0x125   : > { %538 = vmatprep.subr.mxu0 %v779_v22  ;;  %548 = vmatpush3.msra.mxu1 %v876_v4  ;;  %s216_s2 = sld [smem:[#allocation8 + %s215_s1]]  ;;  %s223_s20 = sadd.s32 2, %s206_s5 }
 0x126   : > { %539 = vmatpush3.msra.mxu0 %v882_v7  ;;  %549 = vmatprep.subr.mxu1 %v779_v22  ;;  %s224_s21 = sld [smem:[#allocation8 + %s223_s20]]  ;;  %s782_s10 = smov 64  }
 0x127   : > { %540 = vmatprep.subr.mxu0 %v779_v22  ;;  %550 = vmatpush3.msra.mxu1 %v874_v3  ;;  %s783_s11 = smov 32   ;;  %s201_s18 = sadd.s32 1, %s766_s18  }
 0x128   : > { %541 = vmatpush3.msra.mxu0 %v880_v6  ;;  %551 = vmatprep.subr.mxu1 %v779_v22  ;;  %v231_v29 = vstv %s900_s19  ;;  %p198_p2 = scmp.ge.s32.totalorder %s201_s18, 8  }
 0x129   : > { %542 = vmatprep.subr.mxu0 %v779_v22  ;;  %552 = vmatpush3.msra.mxu1 %v872_v2  ;;  %vm232_vm5 = vcmp.lt.s32.totalorder %v886_v17, %v231_v29  ;;  %s204_s30 = scalar_lea.vmem [#allocation2], %s922_s28  ;;  %s444_s12 = scalar_lea.vmem [#allocation17], %s922_s28 }
 0x12a   : > { %543 = vmatpush3.msra.mxu0 %v878_v5  ;;  %553 = vmatprep.subr.mxu1 %v779_v22  ;;  %s208_s22 = scalar_lea.vmem [#allocation18], %s207_s0  ;;  %s212_s23 = scalar_lea.vmem [#allocation17], %s207_s0  ;;  %v499_v30 = vsel %vm232_vm5, 1.0, %v779_v22  ;;  %v205_v43 = vld [vmem:[%s204_s30] sm:$0x1] }
 0x12b   : > { %554 = vmatpush3.msra.mxu1 %v870_v1  ;;  %555 = vmatprep.mubr.msk.f32.mxu1 %vm780_vm3, %v779_v22  ;;  %v209_v23 = vld [vmem:[%s208_s22] sm:$0x1]  ;;  %s217_s24 = scalar_lea.vmem [#allocation18], %s216_s2  ;;  %s220_s25 = scalar_lea.vmem [#allocation17], %s216_s2  ;;  %v314_v49 = vrot.slane %v205_v43, %v313_v48 }
 0x12c   : > { %v213_v24 = vld [vmem:[%s212_s23] sm:$0x1]  ;;  %211 = vst.msk [vmem:[#allocation3] sm:$0x1] %vm210_vm4, %v209_v23  ;;  %s225_s26 = scalar_lea.vmem [#allocation18], %s224_s21  ;;  %s228_s27 = scalar_lea.vmem [#allocation17], %s224_s21 }
 0x12d   : > { %214 = vst.msk [vmem:[#allocation4] sm:$0x1] %vm210_vm4, %v213_v24  ;;  %v218_v25 = vld [vmem:[%s217_s24] sm:$0x1]  ;;  %s450_s4 = scalar_lea.vmem [#allocation18], %s922_s28  ;;  %s784_s13 = smov (%p198_p2), [#allocation17]  }
 0x12e   : > { %v221_v26 = vld [vmem:[%s220_s25] sm:$0x1]  ;;  %219 = vst.msk [vmem:[#allocation3 + $0x1] sm:$0x1] %vm210_vm4, %v218_v25  ;;  %s458_s14 = sshll.u32 (%p198_p2), %s784_s13, 4  ;;  %s785_s15 = smov (%p198_p2), [#allocation18]   ;;  %s459_s14 = int_to_ptr.vmem [resolvable:$true] %s458_s14 }
 0x12f   : > { %222 = vst.msk [vmem:[#allocation4 + $0x1] sm:$0x1] %vm210_vm4, %v221_v26  ;;  %v226_v27 = vld [vmem:[%s225_s26] sm:$0x1]  ;;  %s468_s16 = sshll.u32 (%p198_p2), %s785_s15, 4  ;;  %s708_s3 = scalar_lea.vmem (%p198_p2), %s459_s14, 128  ;;  %s469_s16 = int_to_ptr.vmem [resolvable:$true] %s468_s16 }
 0x130   : > { %v229_v28 = vld [vmem:[%s228_s27] sm:$0x1]  ;;  %227 = vst.msk [vmem:[#allocation3 + $0x2] sm:$0x1] %vm210_vm4, %v226_v27  ;;  %p709_p3 = scmp.ne.s32.totalorder (%p198_p2), %s459_s14, %s708_s3  ;;  %p713_p4 = scmp.lt.s32.totalorder (%p198_p2), %s459_s14, %s459_s14 }
 0x131   : > { %230 = vst.msk [vmem:[#allocation4 + $0x2] sm:$0x1] %vm210_vm4, %v229_v28  ;;  %p714_p5 = scmp.lt.s32.totalorder (%p198_p2), %s708_s3, %s708_s3 }
 0x133   :  { %p715_p6 = por (%p198_p2), %p714_p5, %p713_p4 }
 0x135   :  { %p716_p7 = pnand (%p198_p2), %p715_p6, %p709_p3 }
 0x137   : > { %v235_v31 = vld [vmem:[#allocation3] sm:$0xff] }
 0x138   : > { %v236_v32 = vmul.f32 %v499_v30, %v235_v31  ;;  %v237_v42 = vld [vmem:[#allocation4] sm:$0xff] }
 0x13a   : > { %545 = vmatmul.mubr.msk.f32.vlgmr.msra.gmra.mxu0 %vm181_vm0, %v236_v32  ;;  %v340_v33 = vsel %vm181_vm0, %v236_v32, 0.0 }
 0x13b   : > { %v341_v34 = vrot.slane %v340_v33, 4 }
 0x13d   : > { %v342_v35 = vadd.f32 %v341_v34, %v340_v33 }
 0x13f   : > { %v343_v36 = vrot.slane %v342_v35, 2 }
 0x141   : > { %v344_v37 = vadd.f32 %v343_v36, %v342_v35 }
 0x143   : > { %v345_v38 = vrot.slane %v344_v37, 1 }
 0x145   : > { %v346_v39 = vadd.f32 %v345_v38, %v344_v37 }
 0x147   : > { %556 = vmatmul.mubr.msk.f32.vlgmr.msra.gmra.mxu1 %vm181_vm0, %v346_v39 }
 0x1fa   : > { %v307_v40 = vpop.f32.mrf.mxu0 }
 0x1fb   : > { %316 = vrot.lane.b32.xlu0 %v307_v40, %s781_s29 }
 0x1fc   : > { %v546_v41 = vpop.f32.mrf.mxu0 }
 0x1ff   : > { %327 = vrot.lane.b32.xlu0 %v237_v42, %s781_s29 }
 0x207   : > { %v416_v44 = vpop.f32.mrf.mxu1 }
 0x208   : > { %v420_v45 = vadd.f32 %v416_v44, %v205_v43 }
 0x209   : > { %v557_v46 = vpop.f32.mrf.mxu1 }
 0x20a   : > { %584 = vtanh.f32 %v420_v45  ;;  %v503_v10 = vmul.f32 -1.442695, %v420_v45 }
 0x217   : > { %v585_v47 = vpop.eup %584 }
 0x218   : > { %429 = vrot.lane.b32.xlu1 %v585_v47, %s782_s10 }
 0x26d   : > { %v317_v50 = vpop.permute.xlu0 %316 }
 0x26e   : > { %v319_v51 = vadd.f32 %v317_v50, %v314_v49 }
 0x270   : > { %v501_v52 = vmul.f32 -1.442695, %v319_v51 }
 0x271   : > { %v328_v55 = vpop.permute.xlu0 %327 }
 0x272   : > { %586 = vpow2.f32 %v501_v52 }
 0x27f   : > { %v587_v53 = vpop.eup %586 }
 0x280   : > { %v323_v54 = vadd.f32 1.0, %v587_v53 }
 0x282   : > { %588 = vrcp.f32 %v323_v54 }
 0x283   : > { %590 = vpow2.f32 %v503_v10 }
 0x28a   : > { %v430_v14 = vpop.permute.xlu1 %429 }
 0x28f   : > { %v589_v56 = vpop.eup %588 }
 0x290   : > { %v330_v57 = vmul.f32 %v589_v56, %v328_v55  ;;  %v591_v11 = vpop.eup %590 }
 0x291   : > { %v424_v12 = vadd.f32 1.0, %v591_v11 }
 0x292   : > { %v331_v58 = vmul.f32 %v499_v30, %v330_v57 }
 0x293   : > { %592 = vrcp.f32 %v424_v12 }
 0x294   : > { %v333_v59 = vsel %vm332_vm6, %v331_v58, 0.0 }
 0x295   : > { %v334_v60 = vrot.slane %v333_v59, 4 }
 0x297   : > { %v335_v61 = vadd.f32 %v334_v60, %v333_v59 }
 0x299   : > { %v336_v62 = vrot.slane %v335_v61, 2 }
 0x29b   : > { %v337_v63 = vadd.f32 %v336_v62, %v335_v61 }
 0x29d   : > { %v338_v0 = vrot.slane %v337_v63, 1 }
 0x29f   : > { %v339_v9 = vadd.f32 %v338_v0, %v337_v63 }
 0x2a0   : > { %v593_v13 = vpop.eup %592 }
 0x2a1   : > { %434 = vrot.lane.b32.xlu1 %v339_v9, %s783_s11  ;;  %v432_v15 = vmul.f32 %v593_v13, %v430_v14 }
 0x313   : > { %v435_v16 = vpop.permute.xlu1 %434 }
 0x314   : > { %v437_v18 = vadd.f32 %v435_v16, %v432_v15 }
 0x316   : > { %594 = vtanh.f32 %v437_v18  ;;  %445 = vst.msk [vmem:[%s444_s12] sm:$0x1] %vm210_vm4, %v437_v18 }
 0x323   : > { %v595_v19 = vpop.eup %594 }
 0x324   : > { %440 = vrot.lane.b32.xlu0 %v595_v19, %s783_s11 }
 0x396   : > { %v441_v20 = vpop.permute.xlu0 %440 }
 0x397   : > { %v443_v21 = vmul.f32 %v593_v13, %v441_v20 }
 0x399   : > { %447 = vrot.lane.b32.xlu1 %v443_v21, %s781_s29 }
 0x408   :  { %200 = sbr.rel (!%p198_p2) target bundleno = 290 (0x122), region = 80 }
 0x40b   : > { %v448_v22 = vpop.permute.xlu1 %447 }
 0x40c   : > { %451 = vst.msk [vmem:[%s450_s4] sm:$0x1] %vm210_vm4, %v448_v22 }
 0x40d   :  { %719 = shalt.err (!%p716_p7)
}
 0x40e   :  { %461 = dma.vmem_to_hbm [thread:$0]  %s459_s14, 128, %s948_s8, [#allocation11]  }
 0x40f   :  { %s728_s7 = scalar_lea.vmem %s469_s16, 128  ;;  %p733_p9 = scmp.lt.s32.totalorder %s469_s16, %s469_s16 }
 0x410   :  { %p729_p8 = scmp.ne.s32.totalorder %s469_s16, %s728_s7  ;;  %p734_p10 = scmp.lt.s32.totalorder %s728_s7, %s728_s7 }
 0x412   :  { %p735_p11 = por %p734_p10, %p733_p9 }
 0x414   :  { %p736_p12 = pnand %p735_p11, %p729_p8 }
 0x416   :  { %739 = shalt.err (!%p736_p12)
}
 0x417   :  { %471 = dma.vmem_to_hbm [thread:$0]  %s469_s16, 128, %s949_s9, [#allocation19]  }
 0x418   :  { %760 = dma.done.wait [#allocation11], 128  }
 0x419   :  { %761 = vsyncadd [#allocation11], 4294967168 }
 0x41a   :  { %762 = dma.done.wait [#allocation19], 128  }
 0x41b   :  { %763 = vsyncadd [#allocation19], 4294967168 }
 0x41c   :  { %478 = vsyncpa [#allocation10], 1 }
 0x41d   :  { %479 = vsyncpa [#allocation13], 1 }
 0x41e   :  { %480 = vsyncpa [#allocation16], 1 }
 0x41f   :  { %481 = vsyncpa [#allocation11], 1 }
 0x420   :  { %482 = vsyncpa [#allocation19], 1 }

</bundles_post_ra>
